<compile_context>
chip_gen: v7x
topology: tpu7x:2x2x1
jax: 0.10.0
libtpu: 0.0.40
codegen_flags: <defaults>
</compile_context>

<pallas_src>
import functools

import jax
import jax.numpy as jnp
from jax import lax
from jax.experimental import pallas as pl
from jax.experimental.pallas import tpu as pltpu


def _round_up(a, b):
    return ((a + b - 1) // b) * b


def _cdiv(a, b):
    return -(-a // b)


def _vmem_capacity_bytes():
    """Best-effort per-core VMEM capacity; conservative fallback (v7x)."""
    try:
        info = pltpu.get_tpu_info()
        for attr in ("vmem_capacity_bytes", "vmem_size_bytes", "vmem_bytes"):
            v = getattr(info, attr, None)
            if v:
                return int(v)
    except Exception:
        pass
    return 64 * 1024 * 1024


def _pick_tiling(n, c, hw_pad, nc_pad, x_isz, w_isz, out_isz, vmem_limit):
    """Return (tile_n, c_per_step, c_steps) fitting the VMEM budget."""
    n_pad8 = _round_up(max(n, 1), 8)

    tile_cap = 512 if vmem_limit >= 96 * 1024 * 1024 else 256
    # Guarantee >=2 batch grid steps when the batch allows it, so v7x's two
    # TensorCores both get work via the "parallel" batch axis.
    if n_pad8 >= 16:
        batch_cap = max(8, (n_pad8 // 2) // 8 * 8)
    else:
        batch_cap = n_pad8
    tile_cap = max(8, min(tile_cap, batch_cap))

    # Grid-invariant blocks (assume double-buffered by the pipeline) + slack
    # for compiler-internal scratch / vregs.
    fixed = 2 * nc_pad * hw_pad * w_isz + 2 * 8 * nc_pad * 4
    slack = 2 * 1024 * 1024
    avail = vmem_limit - fixed - slack

    x_row = 2 * hw_pad * x_isz                       # per row, per channel (2 bufs)
    other_row = 2 * nc_pad * out_isz + hw_pad * 4    # out block + f32 partial sum

    # Preferred path: whole C per step, single batch grid axis.
    if avail > 0:
        t = avail // (c * x_row + other_row)
        t = int(min(tile_cap, (t // 8) * 8))
        if t >= 8:
            steps = _cdiv(n_pad8, t)
            t = _round_up(_cdiv(n_pad8, steps), 8)   # minimize batch padding
            return t, c, 1

    # Fallback: split C across a trailing "arbitrary" grid axis (adds an f32
    # accumulator row) so VMEM stays bounded for very large C*HW.
    other_row_acc = other_row + hw_pad * 4
    if avail > 0:
        for t in (256, 128, 64, 32, 16, 8):
            t = max(8, min(t, tile_cap))
            cps = int((avail // t - other_row_acc) // x_row)
            if cps >= 1:
                cps = min(cps, c)
                steps = _cdiv(n_pad8, t)
                t = _round_up(_cdiv(n_pad8, steps), 8)
                return t, cps, _cdiv(c, cps)

    # Last resort: minimal blocks (may still exceed the limit for huge HW).
    return 8, 1, c


def _channel_sum_f32(x_ref, hw_pad, c_per_step):
    # Static 128-aligned lane-range slices of a 2-D (tile_n, c_per_step*hw_pad)
    # block: plain unrolled VPU adds, no cross-sublane reduce.
    s = x_ref[:, 0:hw_pad].astype(jnp.float32)
    for k in range(1, c_per_step):
        lo = k * hw_pad
        s = s + x_ref[:, lo:lo + hw_pad].astype(jnp.float32)
    return s


def _finalize(sum_f32, w_ref, b_ref, o_ref, inv_c, use_bf16_matmul):
    if use_bf16_matmul:
        lhs = sum_f32.astype(jnp.bfloat16)   # weight pre-cast in the wrapper
        rhs = w_ref[...]
    else:
        lhs = sum_f32
        rhs = w_ref[...]
        if rhs.dtype != jnp.float32:
            rhs = rhs.astype(jnp.float32)
    # (tile_n, HW_pad) x (nc_pad, HW_pad) contracted on last axes ->
    # (tile_n, nc_pad): lane-dense weight tile, lane-dense output.
    out = lax.dot_general(
        lhs, rhs,
        dimension_numbers=(((1,), (1,)), ((), ())),
        preferred_element_type=jnp.float32,
    )
    # Fold 1/C into the small result, then broadcast the f32 bias.
    o_ref[...] = (out * jnp.float32(inv_c)
                  + b_ref[...].astype(jnp.float32)).astype(o_ref.dtype)


def cnn_head_kernel_single(x_ref, w_ref, b_ref, o_ref, *,
                           hw_pad, c_per_step, inv_c, use_bf16_matmul):
    s = _channel_sum_f32(x_ref, hw_pad, c_per_step)
    _finalize(s, w_ref, b_ref, o_ref, inv_c, use_bf16_matmul)


def cnn_head_kernel_csplit(x_ref, w_ref, b_ref, o_ref, acc_ref, *,
                           hw_pad, c_per_step, inv_c, use_bf16_matmul):
    part = _channel_sum_f32(x_ref, hw_pad, c_per_step)
    ci = pl.program_id(1)

    @pl.when(ci == 0)
    def _():
        acc_ref[...] = part

    @pl.when(ci > 0)
    def _():
        acc_ref[...] = acc_ref[...] + part

    @pl.when(ci == pl.num_programs(1) - 1)
    def _():
        _finalize(acc_ref[...], w_ref, b_ref, o_ref, inv_c, use_bf16_matmul)


def cnn_forward(x_nchw, weight, bias, *, use_bf16_matmul=False,
                use_bf16_activations=False, max_c_per_step=None):
    """x_nchw: (N, C, H, W).  weight: (num_classes, H*W).  bias: (num_classes,)."""
    n, c, h, w = x_nchw.shape
    hw = h * w
    num_classes = weight.shape[0]

    hw_pad = _round_up(hw, 128)          # lane-dense per-channel width
    nc_pad = _round_up(num_classes, 128)  # lane-dense weight rows / output cols
    out_dtype = jnp.promote_types(x_nchw.dtype, weight.dtype)

    x_dtype = jnp.bfloat16 if use_bf16_activations else x_nchw.dtype
    w_dtype = jnp.bfloat16 if use_bf16_matmul else weight.dtype

    # Per-generation VMEM budget: ~48 MiB on v7x (64 MiB physical),
    # ~96 MiB on v5e/v6e (128 MiB physical).
    vmem_cap = _vmem_capacity_bytes()
    vmem_limit = int(min(max(vmem_cap - 16 * 1024 * 1024, 32 * 1024 * 1024),
                         96 * 1024 * 1024))

    tile_n, c_per_step, c_steps = _pick_tiling(
        n, c, hw_pad, nc_pad,
        x_isz=jnp.dtype(x_dtype).itemsize,
        w_isz=jnp.dtype(w_dtype).itemsize,
        out_isz=jnp.dtype(out_dtype).itemsize,
        vmem_limit=vmem_limit)

    if max_c_per_step is not None and int(max_c_per_step) < c_per_step:
        c_per_step = int(max_c_per_step)
        c_steps = _cdiv(c, c_per_step)

    c_pad = c_per_step * c_steps
    n_pad = _round_up(max(n, 1), tile_n)

    # Wrapper-side layout plumbing: (N,C,H,W) -> (N,C,HW) -> zero-pad
    # batch / channels / HW -> (N_pad, C_pad*HW_pad) with HW on the lane axis.
    x3 = x_nchw.reshape(n, c, hw).astype(x_dtype)
    x3 = jnp.pad(x3, ((0, n_pad - n), (0, c_pad - c), (0, hw_pad - hw)))
    x_flat = x3.reshape(n_pad, c_pad * hw_pad)

    w_p = jnp.pad(weight, ((0, nc_pad - num_classes), (0, hw_pad - hw)))
    w_p = w_p.astype(w_dtype)                                   # (nc_pad, hw_pad)
    b_p = jnp.pad(bias, (0, nc_pad - num_classes))
    b_p = b_p.astype(jnp.float32).reshape(1, nc_pad)            # f32 bias row

    common = dict(hw_pad=hw_pad, c_per_step=c_per_step, inv_c=1.0 / c,
                  use_bf16_matmul=use_bf16_matmul)

    flops = 2 * n_pad * hw_pad * nc_pad + n_pad * c_pad * hw_pad
    bytes_accessed = (x_flat.size * x_flat.dtype.itemsize
                      + w_p.size * w_p.dtype.itemsize
                      + b_p.size * b_p.dtype.itemsize
                      + n_pad * nc_pad * jnp.dtype(out_dtype).itemsize)

    if c_steps == 1:
        kernel = functools.partial(cnn_head_kernel_single, **common)
        grid = (n_pad // tile_n,)
        in_specs = [
            pl.BlockSpec((tile_n, c_pad * hw_pad), lambda i: (i, 0)),
            pl.BlockSpec((nc_pad, hw_pad), lambda i: (0, 0)),
            pl.BlockSpec((1, nc_pad), lambda i: (0, 0)),
        ]
        out_specs = pl.BlockSpec((tile_n, nc_pad), lambda i: (i, 0))
        scratch_shapes = ()
        dim_sem = ("parallel",)
    else:
        kernel = functools.partial(cnn_head_kernel_csplit, **common)
        grid = (n_pad // tile_n, c_steps)
        in_specs = [
            pl.BlockSpec((tile_n, c_per_step * hw_pad), lambda i, ci: (i, ci)),
            pl.BlockSpec((nc_pad, hw_pad), lambda i, ci: (0, 0)),
            pl.BlockSpec((1, nc_pad), lambda i, ci: (0, 0)),
        ]
        out_specs = pl.BlockSpec((tile_n, nc_pad), lambda i, ci: (i, 0))
        scratch_shapes = (pltpu.VMEM((tile_n, hw_pad), jnp.float32),)
        dim_sem = ("parallel", "arbitrary")

    out = pl.pallas_call(
        kernel,
        out_shape=jax.ShapeDtypeStruct((n_pad, nc_pad), out_dtype),
        grid_spec=pltpu.PrefetchScalarGridSpec(
            num_scalar_prefetch=0,
            grid=grid,
            in_specs=in_specs,
            out_specs=out_specs,
            scratch_shapes=scratch_shapes,
        ),
        compiler_params=pltpu.CompilerParams(
            dimension_semantics=dim_sem,
            vmem_limit_bytes=vmem_limit,
        ),
        cost_estimate=pl.CostEstimate(
            flops=flops, transcendentals=0, bytes_accessed=bytes_accessed),
    )(x_flat, w_p, b_p)

    return out[:n, :num_classes]


def reference_forward(x_nchw, weight, bias):
    n, c, h, w = x_nchw.shape
    output = jnp.sum(x_nchw, axis=1, keepdims=True) / c
    output = output.reshape(n, h * w)
    return output @ weight.T + bias


if __name__ == "__main__":
    key = jax.random.PRNGKey(0)
    k_x, k_w, k_b = jax.random.split(key, 3)

    # Small shapes consistent with the module's forward.
    N, C, H, W = 2, 4, 16, 16
    NUM_CLASSES = 10
    HW = H * W

    x = jax.random.normal(k_x, (N, C, H, W), dtype=jnp.float32)
    # Deterministic parameter init (uniform like torch.nn.Linear default range).
    bound = 1.0 / (HW ** 0.5)
    weight = jax.random.uniform(k_w, (NUM_CLASSES, HW), jnp.float32, -bound, bound)
    bias = jax.random.uniform(k_b, (NUM_CLASSES,), jnp.float32, -bound, bound)

    ref = reference_forward(x, weight, bias)

    # 1) f32 path (tight tolerance).
    out = cnn_forward(x, weight, bias)
    jax.block_until_ready(out)
    assert out.shape == (N, NUM_CLASSES)
    assert jnp.allclose(out, ref, atol=1e-4, rtol=1e-4)

    # 2) bf16 activations + bf16 MXU inputs (halves HBM traffic; f32 accum).
    out_bf16 = cnn_forward(x, weight, bias,
                           use_bf16_matmul=True, use_bf16_activations=True)
    jax.block_until_ready(out_bf16)
    assert out_bf16.shape == (N, NUM_CLASSES)
    assert jnp.allclose(out_bf16, ref, atol=1e-2, rtol=5e-2)

    # 3) Exercise the C-split ("arbitrary" reduction axis) path.
    out_split = cnn_forward(x, weight, bias, max_c_per_step=1)
    jax.block_until_ready(out_split)
    assert out_split.shape == (N, NUM_CLASSES)
    assert jnp.allclose(out_split, ref, atol=1e-4, rtol=1e-4)

    print("KERNEL_OK")
</pallas_src>

<mosaic_0001>
module attributes {stable_mosaic.version = 11 : i64} {
  func.func @cnn_head_kernel_single(%arg0: i32, %arg1: memref<8x1024xf32, #tpu.memory_space<vmem>>, %arg2: memref<128x256xf32, #tpu.memory_space<vmem>>, %arg3: memref<1x128xf32, #tpu.memory_space<vmem>>, %arg4: memref<8x128xf32, #tpu.memory_space<vmem>>) attributes {dimension_semantics = [#tpu.dimension_semantics<parallel>], iteration_bounds = array<i64: 1>, scalar_prefetch = 0 : i64, scratch_operands = 0 : i64, tpu.core_type = #tpu.core_type<tc>, window_params = [{transform_indices = @transform_0, window_bounds = array<i64: 8, 1024>}, {pipeline_mode = #tpu.pipeline_mode<synchronous>, transform_indices = @transform_1, window_bounds = array<i64: 128, 256>}, {pipeline_mode = #tpu.pipeline_mode<synchronous>, transform_indices = @transform_2, window_bounds = array<i64: 1, 128>}, {transform_indices = @transform_3, window_bounds = array<i64: 8, 128>}]} {
    %c0 = arith.constant 0 : index
    %c0_0 = arith.constant 0 : index
    %0 = vector.load %arg1[%c0, %c0_0] : memref<8x1024xf32, #tpu.memory_space<vmem>>, vector<8x256xf32>
    %c0_1 = arith.constant 0 : index
    %c256 = arith.constant 256 : index
    %1 = vector.load %arg1[%c0_1, %c256] : memref<8x1024xf32, #tpu.memory_space<vmem>>, vector<8x256xf32>
    %2 = arith.addf %0, %1 : vector<8x256xf32>
    %c0_2 = arith.constant 0 : index
    %c512 = arith.constant 512 : index
    %3 = vector.load %arg1[%c0_2, %c512] : memref<8x1024xf32, #tpu.memory_space<vmem>>, vector<8x256xf32>
    %4 = arith.addf %2, %3 : vector<8x256xf32>
    %c0_3 = arith.constant 0 : index
    %c768 = arith.constant 768 : index
    %5 = vector.load %arg1[%c0_3, %c768] : memref<8x1024xf32, #tpu.memory_space<vmem>>, vector<8x256xf32>
    %6 = arith.addf %4, %5 : vector<8x256xf32>
    %c0_4 = arith.constant 0 : index
    %c0_5 = arith.constant 0 : index
    %7 = vector.load %arg2[%c0_4, %c0_5] : memref<128x256xf32, #tpu.memory_space<vmem>>, vector<128x256xf32>
    %cst = arith.constant dense<0.000000e+00> : vector<8x128xf32>
    %8 = tpu.matmul %6, %7, %cst {dimension_numbers = #tpu.dot_dimension_numbers<[1], [1], [0], [0], [0, 0, 1, 0], [], []>} : vector<8x256xf32>, vector<128x256xf32>, vector<8x128xf32> -> vector<8x128xf32>
    %cst_6 = arith.constant 2.500000e-01 : f32
    %9 = vector.broadcast %cst_6 : f32 to vector<8x128xf32>
    %10 = arith.mulf %8, %9 : vector<8x128xf32>
    %c0_7 = arith.constant 0 : index
    %c0_8 = arith.constant 0 : index
    %11 = vector.load %arg3[%c0_7, %c0_8] : memref<1x128xf32, #tpu.memory_space<vmem>>, vector<1x128xf32>
    %12 = vector.broadcast %11 : vector<1x128xf32> to vector<8x128xf32>
    %13 = arith.addf %10, %12 : vector<8x128xf32>
    %c0_9 = arith.constant 0 : index
    %c0_10 = arith.constant 0 : index
    %14 = vector.load %arg4[%c0_9, %c0_10] : memref<8x128xf32, #tpu.memory_space<vmem>>, vector<8x128xf32>
    tpu.vector_store %arg4[%c0_9, %c0_10], %13 {strides = array<i32>} : memref<8x128xf32, #tpu.memory_space<vmem>>, vector<8x128xf32>,
    return
  }
  func.func @transform_0(%arg0: i32) -> (i32, i32) {
    %c0_i32 = arith.constant 0 : i32
    %c0_i32_0 = arith.constant 0 : i32
    return %arg0, %c0_i32 : i32, i32
  }
  func.func @transform_1(%arg0: i32) -> (i32, i32) {
    %c0_i32 = arith.constant 0 : i32
    %c0_i32_0 = arith.constant 0 : i32
    %c0_i32_1 = arith.constant 0 : i32
    return %c0_i32, %c0_i32_0 : i32, i32
  }
  func.func @transform_2(%arg0: i32) -> (i32, i32) {
    %c0_i32 = arith.constant 0 : i32
    %c0_i32_0 = arith.constant 0 : i32
    %c0_i32_1 = arith.constant 0 : i32
    return %c0_i32, %c0_i32_0 : i32, i32
  }
  func.func @transform_3(%arg0: i32) -> (i32, i32) {
    %c0_i32 = arith.constant 0 : i32
    %c0_i32_0 = arith.constant 0 : i32
    return %arg0, %c0_i32 : i32, i32
  }
}

</mosaic_0001>

<bundles_post_ra>
// kernel: tpu_custom_call.1
= control target key start
LH: loop header
LB: loop body
LE: loop exit
PB: predicated region body
PF: predicated region fallthrough
CT: control target
= control target key end

     0   :  { %8 = vsyncpa [#allocation3], 0  ;;  %s364_s0 = inlined_call_operand.hbm [shape: f32[8,1024], index: 0, kind: input, shape index: {}]   ;;  %s365_s1 = inlined_call_operand.hbm [shape: f32[128,256], index: 1, kind: input, shape index: {}]   ;;  %s366_s2 = inlined_call_operand.vmem [shape: f32[1,128], index: 2, kind: input, shape index: {}]   ;;  %s367_s3 = inlined_call_operand.hbm [shape: f32[8,128], index: 3, kind: output, shape index: {}]  }
   0x1   :  { %9 = vsyncpa [#allocation6], 0 }
   0x2   :  { %10 = vsyncpa [#allocation4], 0  ;;  %s293_s12 = smov [#allocation2]   ;;  %s294_s14 = smov [#allocation5]  }
   0x3   :  { %s17_s13 = sshll.u32 %s293_s12, 4  ;;  %s26_s15 = sshll.u32 %s294_s14, 4  ;;  %s18_s13 = int_to_ptr.vmem [resolvable:$true] %s17_s13  ;;  %s318_s15 = int_to_ptr.vmem [resolvable:$true] %s26_s15 }
   0x4   :  { %s221_s18 = scalar_lea.hbm %s364_s0, 1024 }
   0x5   :  { %p222_p0 = scmp.ne.s32.totalorder %s364_s0, %s221_s18  ;;  %p225_p1 = scmp.lt.u32.totalorder %s221_s18, %s364_s0 }
   0x7   :  { %p227_p2 = pnand %p225_p1, %p222_p0 }
   0x9   :  { %230 = shalt.err (!%p227_p2)
}
   0xa   :  { %s231_s23 = scalar_lea.vmem %s18_s13, 1024  ;;  %p236_p4 = scmp.lt.s32.totalorder %s18_s13, %s18_s13 }
   0xb   :  { %p232_p3 = scmp.ne.s32.totalorder %s18_s13, %s231_s23  ;;  %p237_p5 = scmp.lt.s32.totalorder %s231_s23, %s231_s23 }
   0xd   :  { %p238_p6 = por %p237_p5, %p236_p4 }
   0xf   :  { %p239_p7 = pnand %p238_p6, %p232_p3 }
  0x11   :  { %242 = shalt.err (!%p239_p7)
}
  0x12   :  { %20 = dma.hbm_to_vmem [thread:$0]  %s364_s0, 1024, %s18_s13, [#allocation3]  }
  0x13   :  { %s243_s28 = scalar_lea.hbm %s365_s1, 4096 }
  0x14   :  { %p244_p8 = scmp.ne.s32.totalorder %s365_s1, %s243_s28  ;;  %p247_p9 = scmp.lt.u32.totalorder %s243_s28, %s365_s1 }
  0x16   :  { %p249_p10 = pnand %p247_p9, %p244_p8 }
  0x18   :  { %252 = shalt.err (!%p249_p10)
}
  0x19   :  { %s253_s6 = scalar_lea.vmem %s318_s15, 4096  ;;  %p258_p12 = scmp.lt.s32.totalorder %s318_s15, %s318_s15 }
  0x1a   :  { %p254_p11 = scmp.ne.s32.totalorder %s318_s15, %s253_s6  ;;  %p259_p13 = scmp.lt.s32.totalorder %s253_s6, %s253_s6 }
  0x1c   :  { %p260_p0 = por %p259_p13, %p258_p12 }
  0x1e   :  { %p261_p1 = pnand %p260_p0, %p254_p11 }
  0x20   :  { %264 = shalt.err (!%p261_p1)
}
  0x21   :  { %s295_s0 = smov 256   ;;  %s296_s7 = smov 16  }
  0x22   :  { %32 = dma.hbm_to_vmem [thread:$0]  %s365_s1, 4096, %s318_s15, [#allocation6], %s295_s0, %s295_s0, %s296_s7  }
  0x23   :  { %287 = dma.done.wait [#allocation3], 1024  }
  0x24   :  { %288 = vsyncadd [#allocation3], 4294966272 }
  0x25   :  { %289 = dma.done.wait [#allocation6], 4096  }
  0x26   :  { %290 = vsyncadd [#allocation6], 4294963200  ;;  %v56_v0 = vld [vmem:[#allocation5 + $0x8] sm:$0xff]  ;;  %v58_v1 = vld [vmem:[#allocation5 + $0x18] sm:$0xff]  ;;  %s297_s11 = smov [#allocation7]  }
  0x27   :  { %v55_v2 = vld [vmem:[#allocation5] sm:$0xff]  ;;  %v184_v3 = vpack.c.bf16 %v58_v1, %v56_v0  ;;  %v57_v4 = vld [vmem:[#allocation5 + $0x10] sm:$0xff]  ;;  %v60_v5 = vld [vmem:[#allocation5 + $0x28] sm:$0xff]  ;;  %s173_s12 = sshll.u32 %s297_s11, 4  ;;  %s174_s12 = int_to_ptr.vmem [resolvable:$true] %s173_s12 }
  0x28   :  { %v62_v6 = vld [vmem:[#allocation5 + $0x38] sm:$0xff]  ;;  %v186_v7 = vpack.c.bf16 %v57_v4, %v55_v2  ;;  %v59_v9 = vld [vmem:[#allocation5 + $0x20] sm:$0xff]  ;;  %v61_v10 = vld [vmem:[#allocation5 + $0x30] sm:$0xff]  ;;  %s265_s13 = scalar_lea.vmem %s174_s12, 128  ;;  %p270_p3 = scmp.lt.s32.totalorder %s174_s12, %s174_s12 }
  0x29   :  { %v188_v8 = vpack.c.bf16 %v62_v6, %v60_v5  ;;  %185 = vmatprep.subr.bf16.mxu0 %v184_v3  ;;  %v64_v11 = vld [vmem:[#allocation5 + $0x48] sm:$0xff]  ;;  %v66_v12 = vld [vmem:[#allocation5 + $0x58] sm:$0xff]  ;;  %v190_v13 = vpack.c.bf16 %v61_v10, %v59_v9  ;;  %v63_v19 = vld [vmem:[#allocation5 + $0x40] sm:$0xff]  ;;  %p266_p2 = scmp.ne.s32.totalorder %s174_s12, %s265_s13  ;;  %p271_p4 = scmp.lt.s32.totalorder %s265_s13, %s265_s13 }
  0x2a   :  { %187 = vmatpush1.bf16.xpose.msra.mxu0 %v186_v7  ;;  %v192_v14 = vpack.c.bf16 %v66_v12, %v64_v11  ;;  %v42_v15 = vld [vmem:[#allocation2 + $0x8] sm:$0xff]  ;;  %v44_v16 = vld [vmem:[#allocation2 + $0x18] sm:$0xff]  ;;  %v65_v20 = vld [vmem:[#allocation5 + $0x50] sm:$0xff] }
  0x2b   :  { %189 = vmatprep.subr.bf16.mxu0 %v188_v8  ;;  %v48_v17 = vld [vmem:[#allocation2 + $0x28] sm:$0xff]  ;;  %v46_v18 = vadd.f32 %v44_v16, %v42_v15  ;;  %v52_v21 = vld [vmem:[#allocation2 + $0x38] sm:$0xff]  ;;  %v194_v25 = vpack.c.bf16 %v65_v20, %v63_v19  ;;  %v67_v28 = vld [vmem:[#allocation5 + $0x60] sm:$0xff]  ;;  %p272_p5 = por %p271_p4, %p270_p3 }
  0x2c   :  { %v68_v22 = vld [vmem:[#allocation5 + $0x68] sm:$0xff]  ;;  %v70_v23 = vld [vmem:[#allocation5 + $0x78] sm:$0xff]  ;;  %v69_v29 = vld [vmem:[#allocation5 + $0x70] sm:$0xff] }
  0x2d   :  { %v50_v24 = vadd.f32 %v48_v17, %v46_v18  ;;  %v196_v27 = vpack.c.bf16 %v70_v23, %v68_v22  ;;  %v72_v30 = vld [vmem:[#allocation5 + $0x88] sm:$0xff]  ;;  %v74_v31 = vld [vmem:[#allocation5 + $0x98] sm:$0xff]  ;;  %v198_v32 = vpack.c.bf16 %v69_v29, %v67_v28  ;;  %v71_v34 = vld [vmem:[#allocation5 + $0x80] sm:$0xff]  ;;  %p273_p6 = pnand %p272_p5, %p266_p2 }
  0x2e   :  { %v200_v33 = vpack.c.bf16 %v74_v31, %v72_v30  ;;  %v73_v35 = vld [vmem:[#allocation5 + $0x90] sm:$0xff]  ;;  %v76_v36 = vld [vmem:[#allocation5 + $0xa8] sm:$0xff]  ;;  %v78_v37 = vld [vmem:[#allocation5 + $0xb8] sm:$0xff] }
  0x2f   :  { %v54_v26 = vadd.f32 %v52_v21, %v50_v24  ;;  %v202_v38 = vpack.c.bf16 %v73_v35, %v71_v34  ;;  %v204_v39 = vpack.c.bf16 %v78_v37, %v76_v36  ;;  %v75_v40 = vld [vmem:[#allocation5 + $0xa0] sm:$0xff]  ;;  %v77_v41 = vld [vmem:[#allocation5 + $0xb0] sm:$0xff]  ;;  %v80_v42 = vld [vmem:[#allocation5 + $0xc8] sm:$0xff] }
  0x30   :  { %v82_v43 = vld [vmem:[#allocation5 + $0xd8] sm:$0xff]  ;;  %v206_v44 = vpack.c.bf16 %v77_v41, %v75_v40  ;;  %v79_v46 = vld [vmem:[#allocation5 + $0xc0] sm:$0xff]  ;;  %v81_v47 = vld [vmem:[#allocation5 + $0xd0] sm:$0xff] }
  0x31   :  { %151 = vmatprep.mubr.f32.mxu0 %v54_v26  ;;  %v208_v45 = vpack.c.bf16 %v82_v43, %v80_v42  ;;  %v84_v48 = vld [vmem:[#allocation5 + $0xe8] sm:$0xff]  ;;  %v86_v49 = vld [vmem:[#allocation5 + $0xf8] sm:$0xff]  ;;  %v210_v50 = vpack.c.bf16 %v81_v47, %v79_v46  ;;  %v41_v52 = vld [vmem:[#allocation2] sm:$0xff] }
  0x32   :  { %191 = vmatpush1.bf16.xpose.msra.mxu0 %v190_v13  ;;  %v212_v51 = vpack.c.bf16 %v86_v49, %v84_v48  ;;  %v43_v53 = vld [vmem:[#allocation2 + $0x10] sm:$0xff]  ;;  %v83_v54 = vld [vmem:[#allocation5 + $0xe0] sm:$0xff] }
  0x33   :  { %193 = vmatprep.subr.bf16.mxu0 %v192_v14  ;;  %v85_v55 = vld [vmem:[#allocation5 + $0xf0] sm:$0xff]  ;;  %v45_v56 = vadd.f32 %v43_v53, %v41_v52  ;;  %v47_v58 = vld [vmem:[#allocation2 + $0x20] sm:$0xff] }
  0x34   :  { %v214_v57 = vpack.c.bf16 %v85_v55, %v83_v54  ;;  %v51_v60 = vld [vmem:[#allocation2 + $0x30] sm:$0xff]  ;;  %v183_v63 = vld [vmem:[%s366_s2] ss:$0 sm:$0xff] }
  0x35   :  { %v49_v59 = vadd.f32 %v47_v58, %v45_v56 }
  0x37   :  { %v53_v61 = vadd.f32 %v51_v60, %v49_v59 }
  0x3a   :  { %195 = vmatpush1.bf16.xpose.msra.mxu0 %v194_v25 }
  0x3b   :  { %197 = vmatprep.subr.bf16.mxu0 %v196_v27 }
  0x42   :  { %199 = vmatpush1.bf16.xpose.msra.mxu0 %v198_v32 }
  0x43   :  { %201 = vmatprep.subr.bf16.mxu0 %v200_v33 }
  0x4a   :  { %203 = vmatpush1.bf16.xpose.msra.mxu0 %v202_v38 }
  0x4b   :  { %205 = vmatprep.subr.bf16.mxu0 %v204_v39 }
  0x52   :  { %207 = vmatpush1.bf16.xpose.msra.mxu0 %v206_v44 }
  0x53   :  { %209 = vmatprep.subr.bf16.mxu0 %v208_v45 }
  0x5a   :  { %211 = vmatpush1.bf16.xpose.msra.mxu0 %v210_v50 }
  0x5b   :  { %213 = vmatprep.subr.bf16.mxu0 %v212_v51 }
  0x62   :  { %215 = vmatpush1.bf16.xpose.msra.mxu0 %v214_v57 }
  0x69   :  { %152 = vmatmul.mubr.f32.vlgmr.msra.gmra.mrb[0].mxu0 %v53_v61 }
 0x13c   :  { %v153_v62 = vpop.f32.mrb[0].mxu0 }
 0x13d   :  { %v157_v0 = vmul.f32 0.25, %v153_v62  ;;  %v155_v1 = vpop.f32.mrb[1].mxu0 }
 0x13f   :  { %v165_v2 = vadd.f32 %v183_v63, %v157_v0 }
 0x141   :  { %166 = vst [vmem:[#allocation7] sm:$0xff] %v165_v2 }
 0x142   :  { %276 = shalt.err (!%p273_p6)
}
 0x143   :  { %s277_s16 = scalar_lea.hbm %s367_s3, 128 }
 0x144   :  { %p278_p7 = scmp.ne.s32.totalorder %s367_s3, %s277_s16  ;;  %p281_p8 = scmp.lt.u32.totalorder %s277_s16, %s367_s3 }
 0x146   :  { %p283_p9 = pnand %p281_p8, %p278_p7 }
 0x148   :  { %286 = shalt.err (!%p283_p9)
}
 0x149   :  { %176 = dma.vmem_to_hbm [thread:$0]  %s174_s12, 128, %s367_s3, [#allocation4]  }
 0x14a   :  { %291 = dma.done.wait [#allocation4], 128  }
 0x14b   :  { %292 = vsyncadd [#allocation4], 4294967168 }
 0x14c   :  { %180 = vsyncpa [#allocation3], 1 }
 0x14d   :  { %181 = vsyncpa [#allocation6], 1 }
 0x14e   :  { %182 = vsyncpa [#allocation4], 1 }

</bundles_post_ra>
